<compile_context>
chip_gen: v7x
topology: tpu7x:2x2x1
jax: 0.10.0
libtpu: 0.0.40
codegen_flags: <defaults>
</compile_context>

<pallas_src>
import numpy as np
import jax
import jax.numpy as jnp
from jax.experimental import pallas as pl
from jax.experimental.pallas import tpu as pltpu


def _drop_path_kernel(x_ref, s_ref, o_ref):
    # x_ref: (TB, TF) tile, s_ref: (TB, 1) f32 per-sample scale (0 or 1/keep_prob).
    # Upcast-multiply in f32 so the rescale factor is not quantized to the
    # input dtype; single VPU broadcast-multiply, purely HBM-bandwidth bound.
    o_ref[...] = (x_ref[...].astype(jnp.float32) * s_ref[...]).astype(o_ref.dtype)


def _generation_params():
    """(target tile bytes, scoped-VMEM limit bytes) tuned per TPU generation."""
    try:
        kind = jax.devices()[0].device_kind.lower()
    except Exception:
        kind = ""
    if "v7" in kind or "7x" in kind:
        # v7x: ~3.2 TB/s HBM/TC -> 2 MiB tiles leave 15-30% per-step overhead.
        # 8 MiB tiles * 4 pipeline buffers = 32 MiB << 64 MiB physical VMEM.
        return 8 * 1024 * 1024, 48 * 1024 * 1024
    if "v6" in kind:
        # 4 MiB tiles * 4 buffers = 16 MiB, inside the 32 MiB scoped default.
        return 4 * 1024 * 1024, 32 * 1024 * 1024
    # v5e / unknown: stay comfortably inside the 16 MiB scoped default.
    return 2 * 1024 * 1024, 16 * 1024 * 1024


def _pick_blocks(B, feat, itemsize, target_bytes):
    """Pick (TB, TF): lane-dense, (8,128)-legal, ~target_bytes per x/out tile."""
    sub = max(8, 32 // itemsize)            # sublane packing: f32=8, bf16=16, int8=32
    row_bytes = feat * itemsize

    # Feature tile: prefer the full contiguous row (one unit-stride DMA per
    # block row, fewest grid steps, maximally lane-dense output stores).
    if row_bytes <= target_bytes:
        tf = feat
    else:
        # Only reachable when feat % 128 == 0 (the wrapper pads odd large feats).
        tf = max(128, (target_bytes // itemsize) // 128 * 128)
        tf = min(tf, feat)

    tb = max(1, target_bytes // (tf * itemsize))
    if tb >= B:
        tb = B                               # full extent is always legal
    else:
        tb = max(sub, (tb // sub) * sub)     # sublane-aligned partial batch tile
        tb = min(tb, B)

    # Keep >= 2 grid steps for large inputs so both v7x TensorCores get work;
    # tiny inputs keep one step (per-step overhead would dominate).
    total_bytes = B * feat * itemsize
    if tb == B and tf == feat and total_bytes > (1 << 20):
        if B >= 2 * sub:
            tb = max(sub, (B // 2) // sub * sub)
        elif feat % 128 == 0 and feat >= 256:
            tf = max(128, (feat // 2) // 128 * 128)
    return int(tb), int(tf)


def drop_path_pallas(x, drop_prob: float = 0.0, training: bool = False,
                     seed: int = 0, donate_x: bool = False):
    """Pallas TPU equivalent of drop_path(x, drop_prob, training)."""
    if drop_prob == 0.0 or not training:
        return x
    keep_prob = 1.0 - drop_prob

    B = int(x.shape[0])
    feat = int(np.prod(x.shape[1:]))
    itemsize = x.dtype.itemsize
    target_bytes, vmem_limit = _generation_params()

    x2 = x.reshape(B, feat)

    # Per-sample Bernoulli(keep_prob) decision, hoisted out of the kernel.
    # random_tensor = floor(keep_prob + U[0,1))  (same as the PyTorch ref).
    # TODO(synk): thread a jax.random key from the caller so different layers
    # / calls don't silently reuse the same mask.
    key = jax.random.PRNGKey(seed)
    u = jax.random.uniform(key, (B, 1), dtype=jnp.float32)
    keep = jnp.floor(jnp.float32(keep_prob) + u)
    scale = keep * jnp.float32(1.0 / keep_prob)      # f32: 0 or 1/keep_prob

    # Large non-128-aligned feature counts: pad to the next multiple of 128 so
    # blocks stay (8,128)-legal and bounded (the old unpadded full-row fallback
    # could exceed scoped VMEM). Small odd feats use the legal full-extent tile.
    sub = max(8, 32 // itemsize)
    feat_p = feat
    if feat % 128 != 0 and sub * feat * itemsize > target_bytes:
        feat_p = -(-feat // 128) * 128
        x2 = jnp.pad(x2, ((0, 0), (0, feat_p - feat)))

    tb, tf = _pick_blocks(B, feat_p, itemsize, target_bytes)
    grid = (pl.cdiv(B, tb), pl.cdiv(feat_p, tf))

    tile_bytes = tb * tf * itemsize
    vmem_limit = max(vmem_limit, 4 * tile_bytes + (2 << 20))

    out = pl.pallas_call(
        _drop_path_kernel,
        out_shape=jax.ShapeDtypeStruct((B, feat_p), x.dtype),
        grid=grid,
        in_specs=[
            pl.BlockSpec((tb, tf), lambda i, j: (i, j)),
            pl.BlockSpec((tb, 1), lambda i, j: (i, 0)),
        ],
        out_specs=pl.BlockSpec((tb, tf), lambda i, j: (i, j)),
        compiler_params=pltpu.CompilerParams(
            # Both axes fully independent -> megacore sharding on v7x.
            dimension_semantics=("parallel", "parallel"),
            vmem_limit_bytes=int(vmem_limit),
        ),
        cost_estimate=pl.CostEstimate(
            flops=B * feat_p,
            transcendentals=0,
            bytes_accessed=2 * B * feat_p * itemsize + B * 4,
        ),
        # Alias x -> out only when the caller actually donates x (otherwise XLA
        # would insert a defensive copy). Padded edge blocks are still written
        # only inside the output's own allocation.
        input_output_aliases=({0: 0} if donate_x else {}),
    )(x2, scale)

    if feat_p != feat:
        out = out[:, :feat]
    return out.reshape(x.shape)


class DropPath:
    """Mirror of the PyTorch DropPath module (forward only)."""

    def __init__(self, drop_prob=None):
        self.drop_prob = drop_prob
        self.training = True

    def __call__(self, x, seed: int = 0):
        p = 0.0 if self.drop_prob is None else float(self.drop_prob)
        return drop_path_pallas(x, p, self.training, seed=seed)


if __name__ == "__main__":
    key = jax.random.PRNGKey(0)
    B, C, H, W = 2, 4, 16, 16
    x = jax.random.normal(key, (B, C, H, W), dtype=jnp.float32)

    # Eval / p=0 path: identity.
    mod_eval = DropPath(drop_prob=0.5)
    mod_eval.training = False
    y_eval = jax.block_until_ready(mod_eval(x))
    assert jnp.allclose(y_eval, x), "eval-mode DropPath must be identity"

    # Training path (f32): per-sample mask, output is either 0 or x / keep_prob.
    drop_prob = 0.5
    keep_prob = 1.0 - drop_prob
    mod = DropPath(drop_prob=drop_prob)
    mod.training = True
    y = jax.block_until_ready(mod(x, seed=1234))

    assert y.shape == x.shape and y.dtype == x.dtype
    y_np = np.asarray(y)
    x_np = np.asarray(x)
    for b in range(B):
        dropped = np.allclose(y_np[b], 0.0, atol=1e-6)
        kept = np.allclose(y_np[b], x_np[b] / keep_prob, atol=1e-5)
        assert dropped or kept, f"sample {b}: not a valid drop-path output"

    # Training path (bf16): verify low-precision handling (f32 upcast inside).
    xb = jax.random.normal(jax.random.PRNGKey(1), (2, 8, 128), dtype=jnp.bfloat16)
    yb = jax.block_until_ready(drop_path_pallas(xb, 0.5, True, seed=7))
    assert yb.shape == xb.shape and yb.dtype == xb.dtype
    yb_np = np.asarray(yb, dtype=np.float32)
    xb_np = np.asarray(xb, dtype=np.float32)
    for b in range(xb.shape[0]):
        dropped = np.allclose(yb_np[b], 0.0, atol=1e-6)
        kept = np.allclose(yb_np[b], xb_np[b] / 0.5, rtol=1e-2, atol=1e-2)
        assert dropped or kept, f"bf16 sample {b}: not a valid drop-path output"

    print("KERNEL_OK")
</pallas_src>

<mosaic_0001>
module attributes {stable_mosaic.version = 11 : i64} {
  func.func @_drop_path_kernel(%arg0: i32, %arg1: i32, %arg2: memref<2x1024xf32, #tpu.memory_space<vmem>>, %arg3: memref<2x1xf32, #tpu.memory_space<vmem>>, %arg4: memref<2x1024xf32, #tpu.memory_space<vmem>>) attributes {dimension_semantics = [#tpu.dimension_semantics<parallel>, #tpu.dimension_semantics<parallel>], iteration_bounds = array<i64: 1, 1>, scalar_prefetch = 0 : i64, scratch_operands = 0 : i64, tpu.core_type = #tpu.core_type<tc>, window_params = [{transform_indices = @transform_0, window_bounds = array<i64: 2, 1024>}, {transform_indices = @transform_1, window_bounds = array<i64: 2, 1>}, {transform_indices = @transform_2, window_bounds = array<i64: 2, 1024>}]} {
    %c0 = arith.constant 0 : index
    %c0_0 = arith.constant 0 : index
    %0 = vector.load %arg2[%c0, %c0_0] : memref<2x1024xf32, #tpu.memory_space<vmem>>, vector<2x1024xf32>
    %c0_1 = arith.constant 0 : index
    %c0_2 = arith.constant 0 : index
    %1 = vector.load %arg3[%c0_1, %c0_2] : memref<2x1xf32, #tpu.memory_space<vmem>>, vector<2x1xf32>
    %2 = vector.broadcast %1 : vector<2x1xf32> to vector<2x1024xf32>
    %3 = arith.mulf %0, %2 : vector<2x1024xf32>
    %c0_3 = arith.constant 0 : index
    %c0_4 = arith.constant 0 : index
    %4 = vector.load %arg4[%c0_3, %c0_4] : memref<2x1024xf32, #tpu.memory_space<vmem>>, vector<2x1024xf32>
    tpu.vector_store %arg4[%c0_3, %c0_4], %3 {strides = array<i32>} : memref<2x1024xf32, #tpu.memory_space<vmem>>, vector<2x1024xf32>,
    return
  }
  func.func @transform_0(%arg0: i32, %arg1: i32) -> (i32, i32) {
    %c0_i32 = arith.constant 0 : i32
    return %arg0, %arg1 : i32, i32
  }
  func.func @transform_1(%arg0: i32, %arg1: i32) -> (i32, i32) {
    %c0_i32 = arith.constant 0 : i32
    %c0_i32_0 = arith.constant 0 : i32
    return %arg0, %c0_i32 : i32, i32
  }
  func.func @transform_2(%arg0: i32, %arg1: i32) -> (i32, i32) {
    %c0_i32 = arith.constant 0 : i32
    return %arg0, %arg1 : i32, i32
  }
}

</mosaic_0001>

<bundles_post_ra>
// kernel: tpu_custom_call.1
= control target key start
LH: loop header
LB: loop body
LE: loop exit
PB: predicated region body
PF: predicated region fallthrough
CT: control target
= control target key end

     0   :  { %7 = vsyncpa [#allocation3], 0  ;;  %s157_s0 = inlined_call_operand.hbm [shape: f32[2,1024], index: 0, kind: input, shape index: {}]   ;;  %s158_s1 = inlined_call_operand.vmem [shape: f32[2,1], index: 1, kind: input, shape index: {}]   ;;  %s159_s2 = inlined_call_operand.hbm [shape: f32[2,1024], index: 2, kind: output, shape index: {}]  }
   0x1   :  { %8 = vsyncpa [#allocation4], 0  ;;  %s111_s9 = smov [#allocation2]   ;;  %s63_s13 = scalar_lea.hbm %s157_s0, 256 }
   0x2   :  { %s15_s10 = sshll.u32 %s111_s9, 4  ;;  %p64_p0 = scmp.ne.s32.totalorder %s157_s0, %s63_s13  ;;  %s16_s10 = int_to_ptr.vmem [resolvable:$true] %s15_s10 }
   0x3   :  { %p67_p1 = scmp.lt.u32.totalorder %s63_s13, %s157_s0 }
   0x5   :  { %p69_p2 = pnand %p67_p1, %p64_p0 }
   0x7   :  { %72 = shalt.err (!%p69_p2)
}
   0x8   :  { %s73_s18 = scalar_lea.vmem %s16_s10, 256  ;;  %p78_p4 = scmp.lt.s32.totalorder %s16_s10, %s16_s10 }
   0x9   :  { %p74_p3 = scmp.ne.s32.totalorder %s16_s10, %s73_s18  ;;  %p79_p5 = scmp.lt.s32.totalorder %s73_s18, %s73_s18 }
   0xb   :  { %p80_p6 = por %p79_p5, %p78_p4 }
   0xd   :  { %p81_p7 = pnand %p80_p6, %p74_p3 }
   0xf   :  { %84 = shalt.err (!%p81_p7)
}
  0x10   :  { %18 = dma.hbm_to_vmem [thread:$0]  %s157_s0, 256, %s16_s10, [#allocation3]  }
  0x11   :  { %107 = dma.done.wait [#allocation3], 256  }
  0x12   :  { %108 = vsyncadd [#allocation3], 4294967040  ;;  %v112_v0 = vmov 0   ;;  %v26_v1 = vld [vmem:[%s158_s1] sm:$0x3]  ;;  %v34_v4 = vlaneseq  ;;  %v25_v10 = vld [vmem:[#allocation2 + $0x8] sm:$0xff] }
  0x13   :  { %62 = vset.pattern.permute.xlu0 %v112_v0  ;;  %v113_v2 = vmov 269488144   ;;  %v24_v9 = vld [vmem:[#allocation2] sm:$0xff]  ;;  %s114_s23 = smov [#allocation5]  }
  0x14   :  { %29 = vperm.xlu0 %62, %v26_v1   ;;  %v32_v3 = vunpack.c.l.s4 %v113_v2  ;;  %v35_v6 = vshrl.u32 %v34_v4, 7  ;;  %s49_s0 = sshll.u32 %s114_s23, 4  ;;  %s50_s0 = int_to_ptr.vmem [resolvable:$true] %s49_s0 }
  0x15   :  { %s85_s24 = scalar_lea.vmem %s50_s0, 256  ;;  %p90_p9 = scmp.lt.s32.totalorder %s50_s0, %s50_s0 }
  0x16   :  { %v33_v5 = vunpack.c.0.s8 %v32_v3  ;;  %p86_p8 = scmp.ne.s32.totalorder %s50_s0, %s85_s24  ;;  %p91_p10 = scmp.lt.s32.totalorder %s85_s24, %s85_s24 }
  0x18   :  { %v36_v7 = vsub.s32 %v33_v5, %v35_v6  ;;  %p92_p11 = por %p91_p10, %p90_p9 }
  0x1a   :  { %p93_p12 = pnand %p92_p11, %p86_p8 }
  0x93   :  { %v30_v8 = vpop.permute.xlu0 %29 }
  0x94   :  { %v37_v11 = vrot.slane %v30_v8, %v36_v7 }
  0x96   :  { %v39_v12 = vmul.f32 %v37_v11, %v24_v9  ;;  %v40_v13 = vmul.f32 %v37_v11, %v25_v10 }
  0x98   :  { %41 = vst [vmem:[#allocation5] sm:$0xff] %v39_v12  ;;  %42 = vst [vmem:[#allocation5 + $0x8] sm:$0xff] %v40_v13 }
  0x99   :  { %96 = shalt.err (!%p93_p12)
}
  0x9a   :  { %s97_s26 = scalar_lea.hbm %s159_s2, 256 }
  0x9b   :  { %p98_p13 = scmp.ne.s32.totalorder %s159_s2, %s97_s26  ;;  %p101_p0 = scmp.lt.u32.totalorder %s97_s26, %s159_s2 }
  0x9d   :  { %p103_p1 = pnand %p101_p0, %p98_p13 }
  0x9f   :  { %106 = shalt.err (!%p103_p1)
}
  0xa0   :  { %52 = dma.vmem_to_hbm [thread:$0]  %s50_s0, 256, %s159_s2, [#allocation4]  }
  0xa1   :  { %109 = dma.done.wait [#allocation4], 256  }
  0xa2   :  { %110 = vsyncadd [#allocation4], 4294967040 }
  0xa3   :  { %56 = vsyncpa [#allocation3], 1 }
  0xa4   :  { %57 = vsyncpa [#allocation4], 1 }

</bundles_post_ra>
